<compile_context>
chip_gen: v7x
topology: tpu7x:2x2x1
jax: 0.10.0
libtpu: 0.0.40
codegen_flags: <defaults>
</compile_context>

<pallas_src>
import functools

import jax
import jax.numpy as jnp
from jax.experimental import pallas as pl
from jax.experimental.pallas import tpu as pltpu


def _round_up(x, m):
    return (x + m - 1) // m * m


def _head_kernel(cls_ref, w1_ref, b1_ref, w2_ref, b2_ref, o_ref, *, h_chunk):
    # cls_ref: [TB, Hp] f32   w1_ref: [Hp, Hp] bf16   b1_ref: [1, Hp] f32
    # w2_ref:  [Hp, Cp] bf16  b2_ref: [1, Cp]  f32    o_ref:  [TB, Cp] f32
    hp = w1_ref.shape[1]
    # Fused activation cast (no bf16 HBM copy of the CLS rows in the wrapper).
    x = cls_ref[...].astype(w1_ref.dtype)

    acc = jnp.zeros(o_ref.shape, jnp.float32)
    # Static Python loop over h_chunk-wide column blocks of W1 / row blocks of
    # W2 keeps the [TB, h_chunk] intermediate in vregs instead of spilling the
    # full [TB, Hp] f32 activation between the two matmuls.
    for k in range(0, hp, h_chunk):
        # pre_fc chunk: bf16 MXU matmul, f32 accumulation.
        z = jnp.dot(x, w1_ref[:, k:k + h_chunk],
                    preferred_element_type=jnp.float32)
        # Bias add + ReLU on the VPU in f32 (v5e-friendly split).
        z = jnp.maximum(z + b1_ref[:, k:k + h_chunk], 0.0)
        # dropout(p=0.1) is identity in eval mode (forward-pass semantics).
        # fc chunk: cast back to the matmul dtype for a clean MXU pass.
        acc = acc + jnp.dot(z.astype(w2_ref.dtype), w2_ref[k:k + h_chunk, :],
                            preferred_element_type=jnp.float32)

    o_ref[...] = (acc + b2_ref[...]).astype(o_ref.dtype)


def prepare_head_params(w1, b1, w2, b2, matmul_dtype=jnp.bfloat16):
    """One-time weight preparation (hoisted out of the per-call hot path).

    w1: [H, H], b1: [H], w2: [H, C], b2: [C]  (weights stored [in, out]).
    Returns (w1_p [Hp,Hp] bf16, b1_p [1,Hp] f32, w2_p [Hp,Cp] bf16, b2_p [1,Cp] f32).
    """
    H = w1.shape[0]
    C = w2.shape[1]
    Hp = _round_up(H, 128)
    Cp = _round_up(C, 128)

    w1_p = w1.astype(matmul_dtype)
    if H != Hp:
        w1_p = jnp.zeros((Hp, Hp), matmul_dtype).at[:H, :H].set(w1_p)

    w2_p = w2.astype(matmul_dtype)
    if (H, C) != (Hp, Cp):
        w2_p = jnp.zeros((Hp, Cp), matmul_dtype).at[:H, :C].set(w2_p)

    b1_p = b1.astype(jnp.float32)
    if H != Hp:
        b1_p = jnp.zeros((Hp,), jnp.float32).at[:H].set(b1_p)
    b1_p = b1_p.reshape(1, Hp)

    b2_p = b2.astype(jnp.float32)
    if C != Cp:
        b2_p = jnp.zeros((Cp,), jnp.float32).at[:C].set(b2_p)
    b2_p = b2_p.reshape(1, Cp)

    return w1_p, b1_p, w2_p, b2_p


@functools.partial(jax.jit, static_argnames=("class_num", "block_b"))
def bert_classification_head(last_hidden_state, w1_p, b1_p, w2_p, b2_p,
                             *, class_num, block_b=None):
    """Hot path. last_hidden_state: [B, S, H]; prepared params from
    `prepare_head_params`. Returns f32 logits [B, class_num]."""
    B, _, H = last_hidden_state.shape
    Hp = w1_p.shape[0]
    Cp = w2_p.shape[1]

    # Batch tile: multiple of 8 sublanes regardless of block_b; 256 rows fills
    # the v6e/v7x 256-wide MXU at large batch, 128 keeps small-batch latency.
    if block_b is None:
        block_b = 256 if B >= 512 else 128
    TB = _round_up(min(block_b, B), 8)
    Bp = _round_up(B, TB)

    # Only the CLS rows ever enter the kernel, and only in f32 — the bf16 cast
    # happens inside the kernel (no extra HBM round-trip of the activation).
    cls = last_hidden_state[:, 0, :]
    if (B, H) != (Bp, Hp):
        cls = jnp.zeros((Bp, Hp), cls.dtype).at[:B, :H].set(cls)

    # Hidden-dim chunk size for the in-kernel loop (keeps z in registers).
    h_chunk = 256 if Hp % 256 == 0 else 128
    h_chunk = min(h_chunk, Hp)

    flops = 2 * Bp * Hp * Hp + 2 * Bp * Hp * Cp
    bytes_accessed = (cls.size * cls.dtype.itemsize
                      + w1_p.size * w1_p.dtype.itemsize
                      + w2_p.size * w2_p.dtype.itemsize
                      + b1_p.size * 4 + b2_p.size * 4
                      + Bp * Cp * 4)

    out = pl.pallas_call(
        functools.partial(_head_kernel, h_chunk=h_chunk),
        out_shape=jax.ShapeDtypeStruct((Bp, Cp), jnp.float32),
        grid_spec=pltpu.PrefetchScalarGridSpec(
            num_scalar_prefetch=0,
            grid=(Bp // TB,),
            in_specs=[
                pl.BlockSpec((TB, Hp), lambda i: (i, 0)),   # per-tile CLS rows (f32)
                pl.BlockSpec((Hp, Hp), lambda i: (0, 0)),   # resident weights
                pl.BlockSpec((1, Hp), lambda i: (0, 0)),    # resident biases
                pl.BlockSpec((Hp, Cp), lambda i: (0, 0)),
                pl.BlockSpec((1, Cp), lambda i: (0, 0)),
            ],
            out_specs=pl.BlockSpec((TB, Cp), lambda i: (i, 0)),
        ),
        compiler_params=pltpu.CompilerParams(
            dimension_semantics=("parallel",),
        ),
        cost_estimate=pl.CostEstimate(
            flops=flops, transcendentals=0, bytes_accessed=bytes_accessed),
    )(cls, w1_p, b1_p, w2_p, b2_p)

    # Padded batch rows / class columns hold garbage (relu(b1)@w2+b2); slice off.
    return out[:B, :class_num]


def _reference_f32(last_hidden_state, w1, b1, w2, b2):
    cls = last_hidden_state[:, 0]
    z = jnp.maximum(cls @ w1 + b1, 0.0)
    return z @ w2 + b2


def _reference_bf16_matched(last_hidden_state, w1, b1, w2, b2):
    # Mirrors the kernel's bf16-operand / f32-accumulate math exactly.
    cls = last_hidden_state[:, 0].astype(jnp.bfloat16)
    z = jnp.dot(cls, w1.astype(jnp.bfloat16),
                preferred_element_type=jnp.float32) + b1
    z = jnp.maximum(z, 0.0).astype(jnp.bfloat16)
    return jnp.dot(z, w2.astype(jnp.bfloat16),
                   preferred_element_type=jnp.float32) + b2


if __name__ == "__main__":
    # Small shapes consistent with the module's forward.
    B, S, H, C = 2, 8, 32, 2

    key = jax.random.PRNGKey(0)
    k_h, k_w1, k_b1, k_w2, k_b2 = jax.random.split(key, 5)

    # Deterministic stand-in for the BERT encoder output.
    last_hidden_state = jax.random.normal(k_h, (B, S, H), dtype=jnp.float32)

    # Deterministic parameter init (pre_fc: H->H, fc: H->C), stored [in, out].
    w1 = jax.random.normal(k_w1, (H, H), dtype=jnp.float32) * 0.05
    b1 = jax.random.normal(k_b1, (H,), dtype=jnp.float32) * 0.05
    w2 = jax.random.normal(k_w2, (H, C), dtype=jnp.float32) * 0.05
    b2 = jax.random.normal(k_b2, (C,), dtype=jnp.float32) * 0.05

    # One-time weight prep (hoisted out of the hot path).
    w1_p, b1_p, w2_p, b2_p = prepare_head_params(w1, b1, w2, b2)

    out = bert_classification_head(last_hidden_state, w1_p, b1_p, w2_p, b2_p,
                                   class_num=C)
    out = jax.block_until_ready(out)
    assert out.shape == (B, C)

    # Module-semantics (f32) reference: loose tolerance because the kernel's
    # matmul operands are bf16 (f32 accumulation).
    ref_f32 = _reference_f32(last_hidden_state, w1, b1, w2, b2)
    err_f32 = float(jnp.max(jnp.abs(out - ref_f32)))
    assert jnp.allclose(out, ref_f32, atol=2e-2, rtol=2e-2), f"f32 ref err {err_f32}"

    # bf16-operand-matched reference: tight tolerance.
    ref_bf16 = _reference_bf16_matched(last_hidden_state, w1, b1, w2, b2)
    err_bf16 = float(jnp.max(jnp.abs(out - ref_bf16)))
    assert jnp.allclose(out, ref_bf16, atol=1e-3, rtol=1e-3), f"bf16 ref err {err_bf16}"

    print("KERNEL_OK")
</pallas_src>

<mosaic_0001>
module attributes {stable_mosaic.version = 11 : i64} {
  func.func @_head_kernel(%arg0: i32, %arg1: memref<8x128xf32, #tpu.memory_space<vmem>>, %arg2: memref<128x128xbf16, #tpu.memory_space<vmem>>, %arg3: memref<1x128xf32, #tpu.memory_space<vmem>>, %arg4: memref<128x128xbf16, #tpu.memory_space<vmem>>, %arg5: memref<1x128xf32, #tpu.memory_space<vmem>>, %arg6: memref<8x128xf32, #tpu.memory_space<vmem>>) attributes {dimension_semantics = [#tpu.dimension_semantics<parallel>], iteration_bounds = array<i64: 1>, scalar_prefetch = 0 : i64, scratch_operands = 0 : i64, tpu.core_type = #tpu.core_type<tc>, window_params = [{transform_indices = @transform_0, window_bounds = array<i64: 8, 128>}, {pipeline_mode = #tpu.pipeline_mode<synchronous>, transform_indices = @transform_1, window_bounds = array<i64: 128, 128>}, {pipeline_mode = #tpu.pipeline_mode<synchronous>, transform_indices = @transform_2, window_bounds = array<i64: 1, 128>}, {pipeline_mode = #tpu.pipeline_mode<synchronous>, transform_indices = @transform_3, window_bounds = array<i64: 128, 128>}, {pipeline_mode = #tpu.pipeline_mode<synchronous>, transform_indices = @transform_4, window_bounds = array<i64: 1, 128>}, {transform_indices = @transform_5, window_bounds = array<i64: 8, 128>}]} {
    %c0 = arith.constant 0 : index
    %c0_0 = arith.constant 0 : index
    %0 = vector.load %arg1[%c0, %c0_0] : memref<8x128xf32, #tpu.memory_space<vmem>>, vector<8x128xf32>
    %1 = arith.truncf %0 : vector<8x128xf32> to vector<8x128xbf16>
    %cst = arith.constant 0.000000e+00 : f32
    %2 = vector.broadcast %cst : f32 to vector<8x128xf32>
    %c0_1 = arith.constant 0 : index
    %c0_2 = arith.constant 0 : index
    %3 = vector.load %arg2[%c0_1, %c0_2] : memref<128x128xbf16, #tpu.memory_space<vmem>>, vector<128x128xbf16>
    %cst_3 = arith.constant dense<0.000000e+00> : vector<8x128xf32>
    %4 = tpu.matmul %1, %3, %cst_3 {dimension_numbers = #tpu.dot_dimension_numbers<[1], [0], [0], [1], [0, 0, 1, 1], [], []>} : vector<8x128xbf16>, vector<128x128xbf16>, vector<8x128xf32> -> vector<8x128xf32>
    %c0_4 = arith.constant 0 : index
    %c0_5 = arith.constant 0 : index
    %5 = vector.load %arg3[%c0_4, %c0_5] : memref<1x128xf32, #tpu.memory_space<vmem>>, vector<1x128xf32>
    %6 = vector.broadcast %5 : vector<1x128xf32> to vector<8x128xf32>
    %7 = arith.addf %4, %6 : vector<8x128xf32>
    %cst_6 = arith.constant 0.000000e+00 : f32
    %8 = vector.broadcast %cst_6 : f32 to vector<8x128xf32>
    %9 = arith.maximumf %7, %8 : vector<8x128xf32>
    %10 = arith.truncf %9 : vector<8x128xf32> to vector<8x128xbf16>
    %c0_7 = arith.constant 0 : index
    %c0_8 = arith.constant 0 : index
    %11 = vector.load %arg4[%c0_7, %c0_8] : memref<128x128xbf16, #tpu.memory_space<vmem>>, vector<128x128xbf16>
    %cst_9 = arith.constant dense<0.000000e+00> : vector<8x128xf32>
    %12 = tpu.matmul %10, %11, %cst_9 {dimension_numbers = #tpu.dot_dimension_numbers<[1], [0], [0], [1], [0, 0, 1, 1], [], []>} : vector<8x128xbf16>, vector<128x128xbf16>, vector<8x128xf32> -> vector<8x128xf32>
    %13 = arith.addf %2, %12 : vector<8x128xf32>
    %c0_10 = arith.constant 0 : index
    %c0_11 = arith.constant 0 : index
    %14 = vector.load %arg5[%c0_10, %c0_11] : memref<1x128xf32, #tpu.memory_space<vmem>>, vector<1x128xf32>
    %15 = vector.broadcast %14 : vector<1x128xf32> to vector<8x128xf32>
    %16 = arith.addf %13, %15 : vector<8x128xf32>
    %c0_12 = arith.constant 0 : index
    %c0_13 = arith.constant 0 : index
    %17 = vector.load %arg6[%c0_12, %c0_13] : memref<8x128xf32, #tpu.memory_space<vmem>>, vector<8x128xf32>
    tpu.vector_store %arg6[%c0_12, %c0_13], %16 {strides = array<i32>} : memref<8x128xf32, #tpu.memory_space<vmem>>, vector<8x128xf32>,
    return
  }
  func.func @transform_0(%arg0: i32) -> (i32, i32) {
    %c0_i32 = arith.constant 0 : i32
    %c0_i32_0 = arith.constant 0 : i32
    return %arg0, %c0_i32 : i32, i32
  }
  func.func @transform_1(%arg0: i32) -> (i32, i32) {
    %c0_i32 = arith.constant 0 : i32
    %c0_i32_0 = arith.constant 0 : i32
    %c0_i32_1 = arith.constant 0 : i32
    return %c0_i32, %c0_i32_0 : i32, i32
  }
  func.func @transform_2(%arg0: i32) -> (i32, i32) {
    %c0_i32 = arith.constant 0 : i32
    %c0_i32_0 = arith.constant 0 : i32
    %c0_i32_1 = arith.constant 0 : i32
    return %c0_i32, %c0_i32_0 : i32, i32
  }
  func.func @transform_3(%arg0: i32) -> (i32, i32) {
    %c0_i32 = arith.constant 0 : i32
    %c0_i32_0 = arith.constant 0 : i32
    %c0_i32_1 = arith.constant 0 : i32
    return %c0_i32, %c0_i32_0 : i32, i32
  }
  func.func @transform_4(%arg0: i32) -> (i32, i32) {
    %c0_i32 = arith.constant 0 : i32
    %c0_i32_0 = arith.constant 0 : i32
    %c0_i32_1 = arith.constant 0 : i32
    return %c0_i32, %c0_i32_0 : i32, i32
  }
  func.func @transform_5(%arg0: i32) -> (i32, i32) {
    %c0_i32 = arith.constant 0 : i32
    %c0_i32_0 = arith.constant 0 : i32
    return %arg0, %c0_i32 : i32, i32
  }
}

</mosaic_0001>

<bundles_post_ra>
// kernel: bert_classification_head.1
= control target key start
LH: loop header
LB: loop body
LE: loop exit
PB: predicated region body
PF: predicated region fallthrough
CT: control target
= control target key end

     0   :  { %10 = vsyncpa [#allocation3], 0  ;;  %s500_s0 = inlined_call_operand.vmem [shape: f32[8,128], index: 0, kind: input, shape index: {}]   ;;  %s501_s1 = inlined_call_operand.hbm [shape: bf16[128,128], index: 1, kind: input, shape index: {}]   ;;  %s502_s2 = inlined_call_operand.vmem [shape: f32[1,128], index: 2, kind: input, shape index: {}]   ;;  %s503_s3 = inlined_call_operand.hbm [shape: bf16[128,128], index: 3, kind: input, shape index: {}]   ;;  %s504_s4 = inlined_call_operand.vmem [shape: f32[1,128], index: 4, kind: input, shape index: {}]   ;;  %s505_s5 = inlined_call_operand.vmem [shape: f32[8,128], index: 5, kind: output, shape index: {}]  }
   0x1   :  { %11 = vsyncpa [#allocation5], 0  ;;  %s428_s18 = smov [#allocation2]   ;;  %s380_s22 = scalar_lea.hbm %s501_s1, 1024 }
   0x2   :  { %s19_s19 = sshll.u32 %s428_s18, 4  ;;  %p381_p0 = scmp.ne.s32.totalorder %s501_s1, %s380_s22  ;;  %s20_s19 = int_to_ptr.vmem [resolvable:$true] %s19_s19 }
   0x3   :  { %p384_p1 = scmp.lt.u32.totalorder %s380_s22, %s501_s1 }
   0x5   :  { %p386_p2 = pnand %p384_p1, %p381_p0 }
   0x7   :  { %389 = shalt.err (!%p386_p2)
}
   0x8   :  { %s390_s27 = scalar_lea.vmem %s20_s19, 1024  ;;  %p395_p4 = scmp.lt.s32.totalorder %s20_s19, %s20_s19 }
   0x9   :  { %p391_p3 = scmp.ne.s32.totalorder %s20_s19, %s390_s27  ;;  %p396_p5 = scmp.lt.s32.totalorder %s390_s27, %s390_s27 }
   0xb   :  { %p397_p6 = por %p396_p5, %p395_p4 }
   0xd   :  { %p398_p7 = pnand %p397_p6, %p391_p3 }
   0xf   :  { %401 = shalt.err (!%p398_p7)
}
  0x10   :  { %s429_s28 = smov 64   ;;  %s430_s29 = smov 4  }
  0x11   :  { %25 = dma.hbm_to_vmem [thread:$0]  %s501_s1, 1024, %s20_s19, [#allocation3], %s429_s28, %s429_s28, %s430_s29  }
  0x12   :  { %s431_s7 = smov [#allocation4]   ;;  %s402_s11 = scalar_lea.hbm %s503_s3, 1024 }
  0x13   :  { %s33_s8 = sshll.u32 %s431_s7, 4  ;;  %p403_p8 = scmp.ne.s32.totalorder %s503_s3, %s402_s11  ;;  %s34_s8 = int_to_ptr.vmem [resolvable:$true] %s33_s8 }
  0x14   :  { %p406_p9 = scmp.lt.u32.totalorder %s402_s11, %s503_s3 }
  0x16   :  { %p408_p10 = pnand %p406_p9, %p403_p8 }
  0x18   :  { %411 = shalt.err (!%p408_p10)
}
  0x19   :  { %s412_s16 = scalar_lea.vmem %s34_s8, 1024  ;;  %p417_p12 = scmp.lt.s32.totalorder %s34_s8, %s34_s8 }
  0x1a   :  { %p413_p11 = scmp.ne.s32.totalorder %s34_s8, %s412_s16  ;;  %p418_p13 = scmp.lt.s32.totalorder %s412_s16, %s412_s16 }
  0x1c   :  { %p419_p0 = por %p418_p13, %p417_p12 }
  0x1e   :  { %p420_p1 = pnand %p419_p0, %p413_p11 }
  0x20   :  { %423 = shalt.err (!%p420_p1)
}
  0x21   :  { %39 = dma.hbm_to_vmem [thread:$0]  %s503_s3, 1024, %s34_s8, [#allocation5], %s429_s28, %s429_s28, %s430_s29  }
  0x22   :  { %424 = dma.done.wait [#allocation3], 1024  }
  0x23   :  { %425 = vsyncadd [#allocation3], 4294966272 }
  0x24   :  { %426 = dma.done.wait [#allocation5], 1024  }
  0x25   :  { %427 = vsyncadd [#allocation5], 4294966272  ;;  %v432_v0 = vmov 0.0   ;;  %vm433_vm0 = vmmov 0   ;;  %v364_v1 = vld [vmem:[#allocation2] sm:$0xff]   ;;  %v365_v2 = vld [vmem:[#allocation2 + $0x8] sm:$0xff]  }
  0x26   :  { %318 = vmatprep.subr.bf16.mxu0 %v432_v0  ;;  %334 = vmatprep.mubr.msk.bf16.mxu0 %vm433_vm0, %v432_v0  ;;  %v366_v3 = vld [vmem:[#allocation2 + $0x10] sm:$0xff]   ;;  %v372_v4 = vld [vmem:[#allocation4] sm:$0xff]   ;;  %v367_v5 = vld [vmem:[#allocation2 + $0x18] sm:$0xff]  }
  0x27   :  { %338 = vmatprep.subr.bf16.mxu1 %v432_v0  ;;  %354 = vmatprep.mubr.msk.bf16.mxu1 %vm433_vm0, %v432_v0  ;;  %v373_v6 = vld [vmem:[#allocation4 + $0x8] sm:$0xff]   ;;  %v368_v7 = vld [vmem:[#allocation2 + $0x20] sm:$0xff]   ;;  %v374_v8 = vld [vmem:[#allocation4 + $0x10] sm:$0xff]  }
  0x28   :  { %319 = vmatpush3.bf16.msra.mxu0 %v364_v1  ;;  %339 = vmatpush3.bf16.msra.mxu1 %v372_v4  ;;  %v369_v9 = vld [vmem:[#allocation2 + $0x28] sm:$0xff]   ;;  %v375_v10 = vld [vmem:[#allocation4 + $0x18] sm:$0xff]   ;;  %v370_v11 = vld [vmem:[#allocation2 + $0x30] sm:$0xff]  }
  0x29   :  { %320 = vmatprep.subr.bf16.mxu0 %v432_v0  ;;  %340 = vmatprep.subr.bf16.mxu1 %v432_v0  ;;  %v376_v12 = vld [vmem:[#allocation4 + $0x20] sm:$0xff]   ;;  %v371_v13 = vld [vmem:[#allocation2 + $0x38] sm:$0xff]   ;;  %v377_v15 = vld [vmem:[#allocation4 + $0x28] sm:$0xff]  }
  0x2a   :  { %v49_v14 = vld [vmem:[%s500_s0] sm:$0xff]  ;;  %v378_v17 = vld [vmem:[#allocation4 + $0x30] sm:$0xff]   ;;  %v379_v18 = vld [vmem:[#allocation4 + $0x38] sm:$0xff]  }
  0x2b   :  { %v50_v16 = vpack.c.bf16 %v49_v14, %v49_v14  ;;  %v282_v19 = vld [vmem:[%s502_s2] ss:$0 sm:$0xff] }
  0x2c   :  { %321 = vmatpush3.bf16.msra.mxu0 %v365_v2  ;;  %341 = vmatpush3.bf16.msra.mxu1 %v373_v6  ;;  %v291_v27 = vld [vmem:[%s504_s4] ss:$0 sm:$0xff] }
  0x2d   :  { %322 = vmatprep.subr.bf16.mxu0 %v432_v0  ;;  %342 = vmatprep.subr.bf16.mxu1 %v432_v0 }
  0x30   :  { %323 = vmatpush3.bf16.msra.mxu0 %v366_v3  ;;  %343 = vmatpush3.bf16.msra.mxu1 %v374_v8 }
  0x31   :  { %324 = vmatprep.subr.bf16.mxu0 %v432_v0  ;;  %344 = vmatprep.subr.bf16.mxu1 %v432_v0 }
  0x34   :  { %325 = vmatpush3.bf16.msra.mxu0 %v367_v5  ;;  %345 = vmatpush3.bf16.msra.mxu1 %v375_v10 }
  0x35   :  { %326 = vmatprep.subr.bf16.mxu0 %v432_v0  ;;  %346 = vmatprep.subr.bf16.mxu1 %v432_v0 }
  0x38   :  { %327 = vmatpush3.bf16.msra.mxu0 %v368_v7  ;;  %347 = vmatpush3.bf16.msra.mxu1 %v376_v12 }
  0x39   :  { %328 = vmatprep.subr.bf16.mxu0 %v432_v0  ;;  %348 = vmatprep.subr.bf16.mxu1 %v432_v0 }
  0x3c   :  { %329 = vmatpush3.bf16.msra.mxu0 %v369_v9  ;;  %349 = vmatpush3.bf16.msra.mxu1 %v377_v15 }
  0x3d   :  { %330 = vmatprep.subr.bf16.mxu0 %v432_v0  ;;  %350 = vmatprep.subr.bf16.mxu1 %v432_v0 }
  0x40   :  { %331 = vmatpush3.bf16.msra.mxu0 %v370_v11  ;;  %351 = vmatpush3.bf16.msra.mxu1 %v378_v17 }
  0x41   :  { %332 = vmatprep.subr.bf16.mxu0 %v432_v0  ;;  %352 = vmatprep.subr.bf16.mxu1 %v432_v0 }
  0x44   :  { %333 = vmatpush3.bf16.msra.mxu0 %v371_v13  ;;  %353 = vmatpush3.bf16.msra.mxu1 %v379_v18 }
  0x47   :  { %335 = vmatmul.mubr.bf16.vlgmr.msra.gmra.mrb[0].mxu0 %v50_v16 }
 0x11a   :  { %v156_v20 = vpop.f32.mrb[0].mxu0 }
 0x11b   :  { %v157_v21 = vadd.f32 %v282_v19, %v156_v20  ;;  %v336_v22 = vpop.f32.mrb[1].mxu0 }
 0x11c   :  { %v159_v23 = vpop.f32.mrb[2].mxu0 }
 0x11d   :  { %v162_v24 = vmax.f32 %v157_v21, 0.0  ;;  %v337_v25 = vpop.f32.mrb[3].mxu0 }
 0x11f   :  { %v163_v26 = vpack.c.bf16 %v162_v24, %v162_v24 }
 0x121   :  { %355 = vmatmul.mubr.bf16.vlgmr.msra.gmra.mrb[0].mxu1 %v163_v26 }
 0x1f4   :  { %v269_v28 = vpop.f32.mrb[0].mxu1 }
 0x1f5   :  { %v270_v29 = vadd.f32 %v291_v27, %v269_v28  ;;  %v356_v30 = vpop.f32.mrb[1].mxu1 }
 0x1f6   :  { %v272_v31 = vpop.f32.mrb[2].mxu1 }
 0x1f7   :  { %275 = vst [vmem:[%s505_s5] sm:$0xff] %v270_v29  ;;  %v357_v32 = vpop.f32.mrb[3].mxu1 }
 0x1f8   :  { %280 = vsyncpa [#allocation3], 1 }
 0x1f9   :  { %281 = vsyncpa [#allocation5], 1 }

</bundles_post_ra>
